<compile_context>
chip_gen: v7x
topology: tpu7x:2x2x1
jax: 0.10.0
libtpu: 0.0.40
codegen_flags: <defaults>
</compile_context>

<pallas_src>
import jax
import jax.numpy as jnp
import numpy as np
from jax.experimental import pallas as pl
from jax.experimental.pallas import tpu as pltpu


# ----------------------- static (numpy, host-side) helpers ----------------------- #

def _gaussian_1d_factors(kernel_sigma):
    """1-D factors of ResizeTransform.gaussian_filter_2d's separable kernel.

    The 2-D kernel built in the PyTorch module is
        norm * exp(-(y-my)^2 / (2 sy^2)) * exp(-(x-mx)^2 / (2 sx^2)),  renormalized
    to sum 1, i.e. exactly the outer product of the two normalized 1-D Gaussians
    returned here (the odd `norm_kernel` constant cancels in the renormalization).
    """
    kernel_size = [int(np.ceil(ks * 3) + np.mod(np.ceil(ks * 3) + 1, 2))
                   for ks in kernel_sigma]
    factors = []
    for ks, sig in zip(kernel_size, kernel_sigma):
        coord = np.arange(ks, dtype=np.float64)
        mean = (ks - 1) / 2.0
        var = float(sig) ** 2.0
        g = np.exp(-((coord - mean) ** 2) / (2.0 * var))
        g = g / g.sum()
        factors.append(g.astype(np.float32))
    return factors


def _same_conv_matrix(size, g1d):
    """Banded matrix implementing 1-D 'same' cross-correlation with zero padding."""
    k = g1d.shape[0]
    p = (k - 1) // 2
    G = np.zeros((size, size), np.float32)
    for i in range(size):
        for t in range(k):
            j = i + t - p
            if 0 <= j < size:
                G[i, j] += g1d[t]
    return G


def _interp_matrix(in_size, out_size):
    """Row matrix of 1-D linear interpolation, align_corners=True (F.interpolate)."""
    A = np.zeros((out_size, in_size), np.float32)
    if out_size == 1:
        A[0, 0] = 1.0
        return A
    scale = (in_size - 1) / (out_size - 1)
    for o in range(out_size):
        src = o * scale
        i0 = min(max(int(np.floor(src)), 0), in_size - 1)
        i1 = min(i0 + 1, in_size - 1)
        w1 = src - i0
        A[o, i0] += 1.0 - w1
        A[o, i1] += w1
    return A


def _build_transfer_matrix(H, W, factor, gaussian_filter_flag):
    """Fold (optional) Gaussian smoothing + align_corners bilinear into one matrix.

    out[b, o*Wo + v] = sum_{h,w} x[b, h*W + w] * M[h*W + w, o*Wo + v]
    """
    Ho = int(np.floor(H * factor[0]))
    Wo = int(np.floor(W * factor[1]))
    Ah = _interp_matrix(H, Ho)                           # (Ho, H)
    Aw = _interp_matrix(W, Wo)                           # (Wo, W)
    if gaussian_filter_flag and factor[0] < 1:
        sigma = [0.44 / f for f in factor]
        gy, gx = _gaussian_1d_factors(sigma)
        Bh = Ah @ _same_conv_matrix(H, gy)               # (Ho, H)
        Bw = Aw @ _same_conv_matrix(W, gx)               # (Wo, W)
    else:
        Bh, Bw = Ah, Aw
    M = np.kron(Bh, Bw).T.astype(np.float32)             # (H*W, Ho*Wo)
    return M, Ho, Wo


# --------------------------------- Pallas kernel --------------------------------- #

def _resize_gemm_kernel(x_ref, m_ref, o_ref):
    """One MXU GEMM per batch tile: (TB, H*W) @ (H*W, Ho*Wo) -> (TB, Ho*Wo)."""
    o_ref[...] = jnp.dot(x_ref[...], m_ref[...],
                         preferred_element_type=jnp.float32).astype(o_ref.dtype)


# ------------------------------------ wrapper ------------------------------------ #

def resize_transform_2d(x_nchw, *, inshape, factor, gaussian_filter_flag=True,
                        vmem_budget_bytes=24 * 1024 * 1024):
    """Forward pass of ResizeTransform (2-D) for input x of shape (N, C, H, W)."""
    ndims = 2
    if isinstance(factor, (int, float)):
        factor = [float(factor)] * ndims
    N, C, H, W = x_nchw.shape
    assert (H, W) == tuple(inshape)

    M_np, Ho, Wo = _build_transfer_matrix(H, W, factor, gaussian_filter_flag)
    HW, HoWo = H * W, Ho * Wo
    M = jnp.asarray(M_np)                                 # (HW, HoWo), VMEM-resident

    B = N * C
    x_flat = x_nchw.astype(jnp.float32).reshape(B, HW)    # free reshape of NCHW layout

    # Batch-axis tile size: the op is HBM-bandwidth / per-step-overhead bound, so make
    # the tile as large as a v7x-safe VMEM budget allows (double-buffered in+out),
    # keep the sublane dim legal (multiple of 8, or == B), and prefer >=2 grid steps
    # so v7x's two TensorCores both get work.
    per_img_bytes = (HW + HoWo) * 4
    tb_cap = max(8, min(2048, vmem_budget_bytes // (2 * per_img_bytes)))
    if B <= tb_cap:
        half = pl.cdiv(B, 2)
        TB = half if (half % 8 == 0) else B
    else:
        TB = (tb_cap // 8) * 8
    grid = (pl.cdiv(B, TB),)

    out = pl.pallas_call(
        _resize_gemm_kernel,
        out_shape=jax.ShapeDtypeStruct((B, HoWo), jnp.float32),
        grid=grid,
        in_specs=[
            pl.BlockSpec((TB, HW), lambda i: (i, 0)),      # activation tile (pipelined)
            pl.BlockSpec((HW, HoWo), lambda i: (0, 0)),    # transfer matrix (resident)
        ],
        out_specs=pl.BlockSpec((TB, HoWo), lambda i: (i, 0)),
        compiler_params=pltpu.CompilerParams(
            dimension_semantics=("parallel",),
            vmem_limit_bytes=48 * 1024 * 1024),            # safe on v7x (64 MiB phys)
    )(x_flat, M)

    return out.reshape(N, C, Ho, Wo)


# ---------------------------- pure-JAX reference check ---------------------------- #

def reference(x_nchw, *, inshape, factor, gaussian_filter_flag=True):
    if isinstance(factor, (int, float)):
        factor = [float(factor)] * 2
    N, C, H, W = x_nchw.shape
    x = x_nchw.astype(jnp.float32)

    if gaussian_filter_flag and factor[0] < 1:
        sigma = [0.44 / f for f in factor]
        gy, gx = _gaussian_1d_factors(sigma)
        g2d = np.outer(gy, gx).astype(np.float32)          # separable 2-D Gaussian
        kh, kw = g2d.shape
        Kfull = np.zeros((C, C, kh, kw), np.float32)        # block-diagonal, as in PyTorch
        for c in range(C):
            Kfull[c, c] = g2d
        x = jax.lax.conv_general_dilated(
            x, jnp.asarray(Kfull), window_strides=(1, 1),
            padding=[((kh - 1) // 2,) * 2, ((kw - 1) // 2,) * 2],
            dimension_numbers=("NCHW", "OIHW", "NCHW"),
            precision=jax.lax.Precision.HIGHEST)

    Ho = int(np.floor(H * factor[0]))
    Wo = int(np.floor(W * factor[1]))

    def interp_axis(a, axis, out_size, in_size):
        if out_size > 1:
            src = jnp.arange(out_size, dtype=jnp.float32) * ((in_size - 1) / (out_size - 1))
        else:
            src = jnp.zeros((1,), jnp.float32)
        i0 = jnp.clip(jnp.floor(src).astype(jnp.int32), 0, in_size - 1)
        i1 = jnp.clip(i0 + 1, 0, in_size - 1)
        w1 = src - i0.astype(jnp.float32)
        w0 = 1.0 - w1
        a0 = jnp.take(a, i0, axis=axis)
        a1 = jnp.take(a, i1, axis=axis)
        sh = [1] * a.ndim
        sh[axis] = out_size
        return a0 * w0.reshape(sh) + a1 * w1.reshape(sh)

    x = interp_axis(x, 2, Ho, H)
    x = interp_axis(x, 3, Wo, W)
    return x


# -------------------------------------- main -------------------------------------- #

if __name__ == "__main__":
    key = jax.random.PRNGKey(0)
    N, C, H, W = 8, 2, 16, 16                 # C == ndims == 2 (2-D vector field)
    x = jax.random.normal(key, (N, C, H, W), dtype=jnp.float32)

    # Down-sampling: factor < 1 -> Gaussian smoothing + bilinear resize.
    out_dn = jax.block_until_ready(resize_transform_2d(x, inshape=(H, W), factor=0.5))
    ref_dn = jax.block_until_ready(reference(x, inshape=(H, W), factor=0.5))
    assert out_dn.shape == (N, C, 8, 8), out_dn.shape
    assert jnp.allclose(out_dn, ref_dn, rtol=5e-3, atol=5e-3), \
        float(jnp.max(jnp.abs(out_dn - ref_dn)))

    # Up-sampling: factor >= 1 -> pure bilinear (Gaussian branch skipped).
    out_up = jax.block_until_ready(resize_transform_2d(x, inshape=(H, W), factor=2.0))
    ref_up = jax.block_until_ready(reference(x, inshape=(H, W), factor=2.0))
    assert out_up.shape == (N, C, 32, 32), out_up.shape
    assert jnp.allclose(out_up, ref_up, rtol=5e-3, atol=5e-3), \
        float(jnp.max(jnp.abs(out_up - ref_up)))

    print("KERNEL_OK")
</pallas_src>

<mosaic_0001>
module attributes {stable_mosaic.version = 11 : i64} {
  func.func @_resize_gemm_kernel(%arg0: i32, %arg1: memref<8x256xf32, #tpu.memory_space<vmem>>, %arg2: memref<256x64xf32, #tpu.memory_space<vmem>>, %arg3: memref<8x64xf32, #tpu.memory_space<vmem>>) attributes {dimension_semantics = [#tpu.dimension_semantics<parallel>], iteration_bounds = array<i64: 2>, scalar_prefetch = 0 : i64, scratch_operands = 0 : i64, tpu.core_type = #tpu.core_type<tc>, window_params = [{transform_indices = @transform_0, window_bounds = array<i64: 8, 256>}, {pipeline_mode = #tpu.pipeline_mode<synchronous>, transform_indices = @transform_1, window_bounds = array<i64: 256, 64>}, {transform_indices = @transform_2, window_bounds = array<i64: 8, 64>}]} {
    %c0 = arith.constant 0 : index
    %c0_0 = arith.constant 0 : index
    %0 = vector.load %arg1[%c0, %c0_0] : memref<8x256xf32, #tpu.memory_space<vmem>>, vector<8x256xf32>
    %c0_1 = arith.constant 0 : index
    %c0_2 = arith.constant 0 : index
    %1 = vector.load %arg2[%c0_1, %c0_2] : memref<256x64xf32, #tpu.memory_space<vmem>>, vector<256x64xf32>
    %cst = arith.constant dense<0.000000e+00> : vector<8x64xf32>
    %2 = tpu.matmul %0, %1, %cst {dimension_numbers = #tpu.dot_dimension_numbers<[1], [0], [0], [1], [0, 0, 1, 1], [], []>} : vector<8x256xf32>, vector<256x64xf32>, vector<8x64xf32> -> vector<8x64xf32>
    %c0_3 = arith.constant 0 : index
    %c0_4 = arith.constant 0 : index
    %3 = vector.load %arg3[%c0_3, %c0_4] : memref<8x64xf32, #tpu.memory_space<vmem>>, vector<8x64xf32>
    tpu.vector_store %arg3[%c0_3, %c0_4], %2 {strides = array<i32>} : memref<8x64xf32, #tpu.memory_space<vmem>>, vector<8x64xf32>,
    return
  }
  func.func @transform_0(%arg0: i32) -> (i32, i32) {
    %c0_i32 = arith.constant 0 : i32
    %c0_i32_0 = arith.constant 0 : i32
    return %arg0, %c0_i32 : i32, i32
  }
  func.func @transform_1(%arg0: i32) -> (i32, i32) {
    %c0_i32 = arith.constant 0 : i32
    %c0_i32_0 = arith.constant 0 : i32
    %c0_i32_1 = arith.constant 0 : i32
    return %c0_i32, %c0_i32_0 : i32, i32
  }
  func.func @transform_2(%arg0: i32) -> (i32, i32) {
    %c0_i32 = arith.constant 0 : i32
    %c0_i32_0 = arith.constant 0 : i32
    return %arg0, %c0_i32 : i32, i32
  }
}

</mosaic_0001>

<bundles_post_ra>
// kernel: tpu_custom_call.1
= control target key start
LH: loop header
LB: loop body
LE: loop exit
PB: predicated region body
PF: predicated region fallthrough
CT: control target
= control target key end

     0   :  { %7 = vsyncpa [#allocation3], 0  ;;  %s719_s0 = inlined_call_operand.vmem [shape: f32[16,256], index: 0, kind: input, shape index: {}]   ;;  %s720_s1 = inlined_call_operand.vmem [shape: f32[256,64], index: 1, kind: input, shape index: {}]   ;;  %s721_s2 = inlined_call_operand.hbm [shape: f32[16,64], index: 2, kind: output, shape index: {}]  }
   0x1   :  { %9 = vsyncpa [#allocation3 + $0x1], 0  ;;  %s519_s9 = smov 0   ;;  %s521_s10 = smov 0  }
   0x2   :  { %s523_s11 = smov 0   ;;  %s525_s12 = smov 0  }
   0x3 LB: > { %s540_s13 = sadd.s32 4294967295, %s501_s12   ;;  %s321_s14 = sadd.s32 4294967294, %s501_s12   ;;  %s501_s12 = sphi %s525_s12, %s727_s12   ;;  %s497_s11 = sphi %s523_s11, %s726_s11   ;;  %s493_s10 = sphi %s521_s10, %s725_s10   ;;  %s489_s9 = sphi %s519_s9, %s724_s9  }
   0x4   : > { %s544_s15 = sadd.s32 1, %s501_s12   ;;  %s69_s16 = sadd.s32 1, %s497_s11 }
   0x5   : > { %s66_s17 = ssub.s32 %s501_s12, %s544_s15  ;;  %p79_p0 = scmp.ne.s32.totalorder %s497_s11, %s493_s10 }
   0x6   : > { %p67_p1 = scmp.eq.s32.totalorder %s66_s17, 0  ;;  %p80_p2 = scmp.eq.s32.totalorder %s540_s13, 1 }
   0x7   : > { %p85_p3 = scmp.ne.s32.totalorder %s493_s10, %s489_s9  ;;  %p86_p4 = scmp.eq.s32.totalorder %s321_s14, 1 }
   0x8   : > { %s555_s18 = scalar_select %p67_p1, %s497_s11, %s69_s16  }
   0x9   : > { %p557_p5 = por %p80_p2, %p79_p0  ;;  %p561_p6 = por %p86_p4, %p85_p3 }
   0xa   : > { %p324_p7 = scmp.ge.s32.totalorder %s501_s12, 1  ;;  %p115_p8 = scmp.lt.s32.totalorder %s501_s12, 3 }
   0xc   : > { %p116_p9 = pnand %p324_p7, %p115_p8 }
   0xd   : > { %v160_v0 = vld [vmem:[%s720_s1 + $0x80] sm:$0xff] (!%p116_p9)  ;;  %v161_v1 = vld [vmem:[%s720_s1 + $0x88] sm:$0xff] (!%p116_p9)  ;;  %p137_p10 = scmp.lt.s32.totalorder (!%p116_p9), %s540_s13, 1  ;;  %v162_v5 = vld [vmem:[%s720_s1 + $0x90] sm:$0xff] (!%p116_p9)  ;;  %s134_s7 = sand.u32 (!%p116_p9), 1, %s493_s10   ;;  %vm246_vm0 = vcmask (!%p116_p9), 523264  }
   0xe   : > { %119 = sbr.rel (%p116_p9) target bundleno = 277 (0x115), region = 28  ;;  %v144_v2 = vld [vmem:[%s720_s1] sm:$0xff] (!%p116_p9)  ;;  %v368_v3 = vpack.c.bf16 (!%p116_p9), %v161_v1, %v160_v0  ;;  %v145_v4 = vld [vmem:[%s720_s1 + $0x8] sm:$0xff] (!%p116_p9)  ;;  %v163_v6 = vld [vmem:[%s720_s1 + $0x98] sm:$0xff] (!%p116_p9)  ;;  %s325_s8 = sshll.u32 (!%p116_p9), %s134_s7, 3 }
   0xf   : > { %v370_v7 = vpack.c.bf16 (!%p116_p9), %v145_v4, %v144_v2  ;;  %v372_v8 = vpack.c.bf16 (!%p116_p9), %v163_v6, %v162_v5  ;;  %v146_v9 = vld [vmem:[%s720_s1 + $0x10] sm:$0xff] (!%p116_p9)  ;;  %v147_v10 = vld [vmem:[%s720_s1 + $0x18] sm:$0xff] (!%p116_p9)  ;;  %v164_v11 = vld [vmem:[%s720_s1 + $0xa0] sm:$0xff] (!%p116_p9)  ;;  %s329_s14 = sshll.u32 (!%p116_p9), %s540_s13, 7  ;;  %s136_s16 = scalar_lea.vmem (!%p116_p9), [#allocation2], %s325_s8 }
  0x10   : > { %369 = vmatprep.subr.bf16.mxu0 (!%p116_p9), %v368_v3  ;;  %v165_v12 = vld [vmem:[%s720_s1 + $0xa8] sm:$0xff] (!%p116_p9)  ;;  %v374_v13 = vpack.c.bf16 (!%p116_p9), %v147_v10, %v146_v9  ;;  %v148_v15 = vld [vmem:[%s720_s1 + $0x20] sm:$0xff] (!%p116_p9)  ;;  %v166_v17 = vld [vmem:[%s720_s1 + $0xb0] sm:$0xff] (!%p116_p9) }
  0x11   : > { %371 = vmatpush3.bf16.msra.mxu0 (!%p116_p9), %v370_v7  ;;  %v376_v14 = vpack.c.bf16 (!%p116_p9), %v165_v12, %v164_v11  ;;  %v149_v16 = vld [vmem:[%s720_s1 + $0x28] sm:$0xff] (!%p116_p9)  ;;  %v167_v18 = vld [vmem:[%s720_s1 + $0xb8] sm:$0xff] (!%p116_p9)  ;;  %v150_v21 = vld [vmem:[%s720_s1 + $0x30] sm:$0xff] (!%p116_p9) }
  0x12   : > { %373 = vmatprep.subr.bf16.mxu0 (!%p116_p9), %v372_v8  ;;  %v378_v19 = vpack.c.bf16 (!%p116_p9), %v149_v16, %v148_v15  ;;  %v380_v20 = vpack.c.bf16 (!%p116_p9), %v167_v18, %v166_v17  ;;  %v151_v22 = vld [vmem:[%s720_s1 + $0x38] sm:$0xff] (!%p116_p9)  ;;  %v168_v23 = vld [vmem:[%s720_s1 + $0xc0] sm:$0xff] (!%p116_p9)  ;;  %v169_v24 = vld [vmem:[%s720_s1 + $0xc8] sm:$0xff] (!%p116_p9) }
  0x13   : > { %v382_v26 = vpack.c.bf16 (!%p116_p9), %v151_v22, %v150_v21  ;;  %v384_v27 = vpack.c.bf16 (!%p116_p9), %v169_v24, %v168_v23  ;;  %v152_v28 = vld [vmem:[%s720_s1 + $0x40] sm:$0xff] (!%p116_p9)  ;;  %v153_v29 = vld [vmem:[%s720_s1 + $0x48] sm:$0xff] (!%p116_p9)  ;;  %v170_v30 = vld [vmem:[%s720_s1 + $0xd0] sm:$0xff] (!%p116_p9) }
  0x14   : > { %v171_v31 = vld [vmem:[%s720_s1 + $0xd8] sm:$0xff] (!%p116_p9)  ;;  %v386_v32 = vpack.c.bf16 (!%p116_p9), %v153_v29, %v152_v28  ;;  %v154_v34 = vld [vmem:[%s720_s1 + $0x50] sm:$0xff] (!%p116_p9)  ;;  %v172_v36 = vld [vmem:[%s720_s1 + $0xe0] sm:$0xff] (!%p116_p9) }
  0x15   : > { %s138_s17 = scalar_select %p137_p10, %s540_s13, 1  ;;  %375 = vmatpush3.bf16.msra.mxu0 %v374_v13  ;;  %v388_v33 = vpack.c.bf16 %v171_v31, %v170_v30  ;;  %v155_v35 = vld [vmem:[%s720_s1 + $0x58] sm:$0xff]  ;;  %v173_v37 = vld [vmem:[%s720_s1 + $0xe8] sm:$0xff]  ;;  %v156_v40 = vld [vmem:[%s720_s1 + $0x60] sm:$0xff] }
  0x16   : > { %377 = vmatprep.subr.bf16.mxu0 %v376_v14  ;;  %v390_v38 = vpack.c.bf16 %v155_v35, %v154_v34  ;;  %v392_v39 = vpack.c.bf16 %v173_v37, %v172_v36  ;;  %v157_v41 = vld [vmem:[%s720_s1 + $0x68] sm:$0xff]  ;;  %v174_v42 = vld [vmem:[%s720_s1 + $0xf0] sm:$0xff]  ;;  %v175_v43 = vld [vmem:[%s720_s1 + $0xf8] sm:$0xff]  ;;  %s503_s13 = smov [#allocation2]  }
  0x17   : > { %s332_s23 = sshll.u32 %s138_s17, 4  ;;  %v394_v44 = vpack.c.bf16 %v157_v41, %v156_v40  ;;  %v396_v45 = vpack.c.bf16 %v175_v43, %v174_v42  ;;  %v158_v46 = vld [vmem:[%s720_s1 + $0x70] sm:$0xff]  ;;  %v159_v47 = vld [vmem:[%s720_s1 + $0x78] sm:$0xff]  ;;  %s262_s17 = sshll.u32 %s136_s16, 4  ;;  %s679_s17 = int_to_ptr.vmem [resolvable:$true] %s262_s17 }
  0x18   : > { %s614_s6 = scalar_lea.vmem %s719_s0, %s332_s23  ;;  %v398_v48 = vpack.c.bf16 %v159_v47, %v158_v46  ;;  %s677_s23 = scalar_lea.hbm %s721_s2, %s329_s14 }
  0x19   : > { %v143_v25 = vld [vmem:[%s614_s6 + $0x8] sm:$0xff]  ;;  %379 = vmatpush3.bf16.msra.mxu0 %v378_v19  ;;  %v142_v49 = vld [vmem:[%s614_s6] sm:$0xff]  ;;  %s249_s6 = scalar_lea.sflag [#allocation3], %s134_s7  ;;  %s439_s24 = scalar_lea.vmem %s679_s17, 128 }
  0x1a   : > { %240 = vmatprep.mubr.f32.mxu0 %v143_v25  ;;  %381 = vmatprep.subr.bf16.mxu0 %v380_v20  ;;  %p440_p11 = scmp.ne.s32.totalorder %s679_s17, %s439_s24  ;;  %s443_s25 = sshll.u32 %s503_s13, 4  ;;  %s444_s25 = int_to_ptr.vmem [resolvable:$false] %s443_s25 }
  0x1b   : > { %s445_s26 = scalar_lea.vmem %s444_s25, 256  ;;  %p446_p0 = scmp.lt.s32.totalorder %s679_s17, %s444_s25 }
  0x1c   : > { %p441_p12 = pnand %p440_p11, %p557_p5  ;;  %p447_p1 = scmp.lt.s32.totalorder %s445_s26, %s439_s24 }
  0x1d   : > { %383 = vmatpush3.bf16.msra.mxu0 %v382_v26 }
  0x1e   : > { %385 = vmatprep.subr.bf16.mxu0 %v384_v27  ;;  %p442_p13 = pneg %p441_p12  ;;  %p448_p2 = por %p447_p1, %p446_p0 }
  0x20   : > { %p449_p3 = pnand %p448_p2, %p442_p13 }
  0x21   : > { %387 = vmatpush3.bf16.msra.mxu0 %v386_v32 }
  0x22   : > { %389 = vmatprep.subr.bf16.mxu0 %v388_v33 }
  0x25   : > { %391 = vmatpush3.bf16.msra.mxu0 %v390_v38 }
  0x26   : > { %393 = vmatprep.subr.bf16.mxu0 %v392_v39 }
  0x29   : > { %395 = vmatpush3.bf16.msra.mxu0 %v394_v44 }
  0x2a   : > { %397 = vmatprep.subr.bf16.mxu0 %v396_v45 }
  0x2d   : > { %399 = vmatpush3.bf16.msra.mxu0 %v398_v48 }
  0x30   : > { %241 = vmatmul.mubr.f32.vlgmr.msra.gmra.mrb[0].mxu0 %v142_v49 }
 0x103   : > { %v365_v50 = vpop.f32.mrb[0].mxu0 }
 0x104   : > { %v366_v51 = vpop.f32.mrb[1].mxu0 }
 0x105   : > { %v367_v52 = vadd.f32 %v366_v51, %v365_v50 }
 0x107   : > { %247 = vst.msk [vmem:[%s136_s16] sm:$0xff] %vm246_vm0, %v367_v52 }
 0x108   : > { %452 = shalt.err (!%p449_p3)
}
 0x109   : > { %s453_s27 = scalar_lea.hbm %s677_s23, 128  ;;  %s457_s30 = scalar_lea.hbm %s721_s2, 256 }
 0x10a   : > { %p454_p4 = scmp.ne.s32.totalorder %s677_s23, %s453_s27  ;;  %p458_p9 = scmp.lt.u32.totalorder %s677_s23, %s721_s2 }
 0x10b   : > { %p459_p10 = scmp.lt.u32.totalorder %s457_s30, %s453_s27  ;;  %p461_p12 = scmp.lt.u32.totalorder %s453_s27, %s677_s23 }
 0x10c   : > { %p455_p7 = pnand %p454_p4, %p557_p5 }
 0x10d   : > { %p460_p11 = por %p459_p10, %p458_p9 }
 0x10e   : > { %p456_p8 = pneg %p455_p7 }
 0x10f   : > { %p462_p13 = por %p461_p12, %p460_p11 }
 0x111   : > { %p463_p0 = pnand %p462_p13, %p456_p8 }
 0x113   : > { %466 = shalt.err (!%p463_p0)
}
 0x114   : > { %400 = dma.vmem_to_hbm [thread:$0]  (%p557_p5), %s679_s17, 128, %s677_s23, %s249_s6  }
 0x115 PF: > { %p406_p1 = scmp.ge.s32.totalorder %s501_s12, 2  ;;  %s274_s5 = sand.u32 1, %s489_s9  }
 0x116   : > { %s275_s7 = scalar_lea.sflag [#allocation3], %s274_s5 }
 0x117   : > { %p403_p2 = pnand %p406_p1, %p561_p6 }
 0x119   : > { %484 = dma.done.wait (!%p403_p2), %s275_s7, 128  }
 0x11a   : > { %486 = vsyncadd (!%p403_p2), %s275_s7, 4294967168  ;;  %p12_p3 = scmp.ge.s32.totalorder %s544_s15, 4   ;;  %s724_s9 = smov %s493_s10 }
 0x11b   : > { %s725_s10 = smov %s497_s11  ;;  %s726_s11 = smov %s555_s18 }
 0x11c   : > { %s727_s12 = smov %s544_s15  ;;  %14 = sbr.rel (!%p12_p3) target bundleno = 3 (0x3), region = 63 }
 0x123   :  { %280 = vsyncpa [#allocation3], 1 }
 0x124   :  { %282 = vsyncpa [#allocation3 + $0x1], 1 }

</bundles_post_ra>
